<compile_context>
chip_gen: v7x
topology: tpu7x:2x2x1
jax: 0.10.0
libtpu: 0.0.40
codegen_flags: <defaults>
</compile_context>

<pallas_src>
import jax
import jax.numpy as jnp
from jax.experimental import pallas as pl
from jax.experimental.pallas import tpu as pltpu


def _proj_kernel_order1(x_ref, w1_ref, w2t_ref, b1_ref, b2_ref, o_ref):
    """(W1 . x) . W2t order -- chosen when z1*F1*(F0+z2) <= z2*F0*(F1+z1)."""
    x = x_ref[...]                                        # (TB, F0, F1)
    tb, f0, f1 = x.shape
    z1 = w1_ref.shape[0]
    # Hoisted broadcast of the (small) invariant weight; JAX does not CSE broadcasts.
    w1b = jnp.broadcast_to(w1_ref[...], (tb, z1, f0))     # (TB, z1, F0)
    # t[b,i,k] = sum_a W1[i,a] * x[b,a,k]  (batched MXU matmul, f32 accumulation)
    t = jnp.einsum("bia,bak->bik", w1b, x,
                   preferred_element_type=jnp.float32)    # (TB, z1, F1)
    t = t + b1_ref[0][None, :, None]
    # y[b,i,j] = sum_k t[b,i,k] * W2t[k,j]  (single 2D MXU matmul on a (TB*z1, F1) slab)
    y = jnp.dot(t.reshape(tb * z1, f1), w2t_ref[...],
                preferred_element_type=jnp.float32)       # (TB*z1, z2)
    y = y.reshape(tb, z1, -1) + b2_ref[0][None, None, :]  # (TB, z1, z2)
    # TODO(synk): optional `activation` callable from the PyTorch module is identity
    # here (module default activation=None).
    o_ref[...] = y.astype(o_ref.dtype)


def _proj_kernel_order2(x_ref, w1_ref, w2t_ref, bias_ref, o_ref):
    """W1 . (x . W2t) order -- chosen when z2*F0*(F1+z1) < z1*F1*(F0+z2).

    Biases are pre-folded in the wrapper: bias[i,j] = b1[i]*sum_k W2[j,k] + b2[j].
    """
    x = x_ref[...]                                        # (TB, F0, F1)
    tb, f0, f1 = x.shape
    z1 = w1_ref.shape[0]
    # g[b,a,j] = sum_k x[b,a,k] * W2t[k,j]  (single 2D MXU matmul on a (TB*F0, F1) slab)
    g = jnp.dot(x.reshape(tb * f0, f1), w2t_ref[...],
                preferred_element_type=jnp.float32)       # (TB*F0, z2)
    g = g.reshape(tb, f0, -1)                             # (TB, F0, z2)
    w1b = jnp.broadcast_to(w1_ref[...], (tb, z1, f0))     # (TB, z1, F0)
    # y[b,i,j] = sum_a W1[i,a] * g[b,a,j]  (batched MXU matmul)
    y = jnp.einsum("bia,baj->bij", w1b, g,
                   preferred_element_type=jnp.float32)    # (TB, z1, z2)
    y = y + bias_ref[...][None, :, :]
    o_ref[...] = y.astype(o_ref.dtype)


def projection_layer(x, w1, b1, w2, b2, *, batch_tile=128):
    """x: (B, F0, F1); w1: (z1, F0); b1: (z1,); w2: (z2, F1); b2: (z2,) -> (B, z1, z2)."""
    B, F0, F1 = x.shape
    z1 = w1.shape[0]
    z2 = w2.shape[0]

    # One-time wrapper transpose of W2 (PyTorch layout (z2, F1) -> (F1, z2)) so the
    # kernel never re-transposes an invariant weight every grid step.
    w2t = jnp.transpose(w2)                               # (F1, z2)

    # Batch tile: TB is a leading block dim so it has no (8,128) constraint; clamp to
    # B and pad B up to a multiple of TB.  (For VMEM-tight v7x, pass a smaller
    # batch_tile; weights here are tiny so default double-buffering is fine.)
    TB = max(1, min(batch_tile, B))
    B_pad = pl.cdiv(B, TB) * TB
    if B_pad != B:
        x = jnp.pad(x, ((0, B_pad - B), (0, 0), (0, 0)))

    # Shape-adaptive association (static): MACs per batch element are
    # z1*F1*(F0+z2) for (W1.x).W2t vs z2*F0*(F1+z1) for W1.(x.W2t).
    order1 = z1 * F1 * (F0 + z2) <= z2 * F0 * (F1 + z1)

    x_spec = pl.BlockSpec((TB, F0, F1), lambda b: (b, 0, 0))
    w1_spec = pl.BlockSpec((z1, F0), lambda b: (0, 0))
    w2t_spec = pl.BlockSpec((F1, z2), lambda b: (0, 0))
    out_spec = pl.BlockSpec((TB, z1, z2), lambda b: (b, 0, 0))

    if order1:
        kernel = _proj_kernel_order1
        bias_args = (b1.reshape(1, z1), b2.reshape(1, z2))
        bias_specs = [pl.BlockSpec((1, z1), lambda b: (0, 0)),
                      pl.BlockSpec((1, z2), lambda b: (0, 0))]
    else:
        kernel = _proj_kernel_order2
        bias_full = b1[:, None] * jnp.sum(w2, axis=1)[None, :] + b2[None, :]  # (z1, z2)
        bias_args = (bias_full,)
        bias_specs = [pl.BlockSpec((z1, z2), lambda b: (0, 0))]

    grid_spec = pltpu.PrefetchScalarGridSpec(
        num_scalar_prefetch=0,
        grid=(B_pad // TB,),
        in_specs=[x_spec, w1_spec, w2t_spec, *bias_specs],
        out_specs=out_spec,
    )

    out = pl.pallas_call(
        kernel,
        out_shape=jax.ShapeDtypeStruct((B_pad, z1, z2), x.dtype),
        grid_spec=grid_spec,
        compiler_params=pltpu.CompilerParams(
            dimension_semantics=("parallel",)),   # batch-tile axis feeds both v7x TCs
    )(x, w1, w2t, *bias_args)

    return out[:B] if B_pad != B else out


def projection_layer_ref(x, w1, b1, w2, b2):
    # Pure-JAX reference mirroring the PyTorch forward exactly.
    xt = jnp.transpose(x, (0, 2, 1))                      # (B, F1, F0)
    h = jnp.einsum("bka,ia->bki", xt, w1) + b1            # (B, F1, z1)
    ht = jnp.transpose(h, (0, 2, 1))                      # (B, z1, F1)
    y = jnp.einsum("bik,jk->bij", ht, w2) + b2            # (B, z1, z2)
    return y


if __name__ == "__main__":
    key = jax.random.PRNGKey(0)

    def run_case(B, F0, F1, z1, z2, key):
        kx, kw1, kb1, kw2, kb2 = jax.random.split(key, 5)
        x = jax.random.normal(kx, (B, F0, F1), dtype=jnp.float32)
        w1 = jax.random.normal(kw1, (z1, F0), dtype=jnp.float32) * 0.1
        b1 = jax.random.normal(kb1, (z1,), dtype=jnp.float32) * 0.1
        w2 = jax.random.normal(kw2, (z2, F1), dtype=jnp.float32) * 0.1
        b2 = jax.random.normal(kb2, (z2,), dtype=jnp.float32) * 0.1

        y = jax.block_until_ready(projection_layer(x, w1, b1, w2, b2))
        y_ref = projection_layer_ref(x, w1, b1, w2, b2)
        assert y.shape == (B, z1, z2), y.shape
        assert jnp.allclose(y, y_ref, atol=1e-5, rtol=1e-5), "mismatch vs reference"

    k1, k2 = jax.random.split(key)
    # Module defaults: in_feats=(F0, F1)=(4, 16), z1=1, z2=8, batch=2 (order-1 path).
    run_case(B=2, F0=4, F1=16, z1=1, z2=8, key=k1)
    # Opposite regime exercises the adaptive order-2 path (W1.(x.W2t) + folded bias).
    run_case(B=2, F0=16, F1=4, z1=8, z2=1, key=k2)

    print("KERNEL_OK")
</pallas_src>

<mosaic_0001>
module attributes {stable_mosaic.version = 11 : i64} {
  func.func @_proj_kernel_order1(%arg0: i32, %arg1: memref<2x4x16xf32, #tpu.memory_space<vmem>>, %arg2: memref<1x4xf32, #tpu.memory_space<vmem>>, %arg3: memref<16x8xf32, #tpu.memory_space<vmem>>, %arg4: memref<1x1xf32, #tpu.memory_space<vmem>>, %arg5: memref<1x8xf32, #tpu.memory_space<vmem>>, %arg6: memref<2x1x8xf32, #tpu.memory_space<vmem>>) attributes {dimension_semantics = [#tpu.dimension_semantics<parallel>], iteration_bounds = array<i64: 1>, scalar_prefetch = 0 : i64, scratch_operands = 0 : i64, tpu.core_type = #tpu.core_type<tc>, window_params = [{transform_indices = @transform_0, window_bounds = array<i64: 2, 4, 16>}, {pipeline_mode = #tpu.pipeline_mode<synchronous>, transform_indices = @transform_1, window_bounds = array<i64: 1, 4>}, {pipeline_mode = #tpu.pipeline_mode<synchronous>, transform_indices = @transform_2, window_bounds = array<i64: 16, 8>}, {pipeline_mode = #tpu.pipeline_mode<synchronous>, transform_indices = @transform_3, window_bounds = array<i64: 1, 1>}, {pipeline_mode = #tpu.pipeline_mode<synchronous>, transform_indices = @transform_4, window_bounds = array<i64: 1, 8>}, {transform_indices = @transform_5, window_bounds = array<i64: 2, 1, 8>}]} {
    %c0 = arith.constant 0 : index
    %c0_0 = arith.constant 0 : index
    %c0_1 = arith.constant 0 : index
    %0 = vector.load %arg1[%c0, %c0_0, %c0_1] : memref<2x4x16xf32, #tpu.memory_space<vmem>>, vector<2x4x16xf32>
    %c0_2 = arith.constant 0 : index
    %c0_3 = arith.constant 0 : index
    %1 = vector.load %arg2[%c0_2, %c0_3] : memref<1x4xf32, #tpu.memory_space<vmem>>, vector<1x4xf32>
    %2 = vector.shape_cast %1 : vector<1x4xf32> to vector<1x1x4xf32>
    %3 = vector.broadcast %2 : vector<1x1x4xf32> to vector<2x1x4xf32>
    "tpu.trace_start"() <{level = 10 : i32, message = "bia,bak->bik"}> : () -> ()
    %cst = arith.constant dense<0.000000e+00> : vector<2x1x16xf32>
    %4 = tpu.matmul %3, %0, %cst {dimension_numbers = #tpu.dot_dimension_numbers<[2], [1], [1], [2], [0, 0, 0, 1, 1, 2], [0], [0]>} : vector<2x1x4xf32>, vector<2x4x16xf32>, vector<2x1x16xf32> -> vector<2x1x16xf32>
    "tpu.trace_stop"() : () -> ()
    %c0_4 = arith.constant 0 : index
    %c0_5 = arith.constant 0 : index
    %5 = vector.load %arg4[%c0_4, %c0_5] : memref<1x1xf32, #tpu.memory_space<vmem>>, vector<1x1xf32>
    %6 = vector.shape_cast %5 : vector<1x1xf32> to vector<1xf32>
    %7 = vector.shape_cast %6 : vector<1xf32> to vector<1x1x1xf32>
    %8 = vector.broadcast %7 : vector<1x1x1xf32> to vector<2x1x16xf32>
    %9 = arith.addf %4, %8 : vector<2x1x16xf32>
    %10 = vector.shape_cast %9 : vector<2x1x16xf32> to vector<2x16xf32>
    %c0_6 = arith.constant 0 : index
    %c0_7 = arith.constant 0 : index
    %11 = vector.load %arg3[%c0_6, %c0_7] : memref<16x8xf32, #tpu.memory_space<vmem>>, vector<16x8xf32>
    %cst_8 = arith.constant dense<0.000000e+00> : vector<2x8xf32>
    %12 = tpu.matmul %10, %11, %cst_8 {dimension_numbers = #tpu.dot_dimension_numbers<[1], [0], [0], [1], [0, 0, 1, 1], [], []>} : vector<2x16xf32>, vector<16x8xf32>, vector<2x8xf32> -> vector<2x8xf32>
    %13 = vector.shape_cast %12 : vector<2x8xf32> to vector<2x1x8xf32>
    %c0_9 = arith.constant 0 : index
    %c0_10 = arith.constant 0 : index
    %14 = vector.load %arg5[%c0_9, %c0_10] : memref<1x8xf32, #tpu.memory_space<vmem>>, vector<1x8xf32>
    %15 = vector.shape_cast %14 : vector<1x8xf32> to vector<8xf32>
    %16 = vector.shape_cast %15 : vector<8xf32> to vector<1x1x8xf32>
    %17 = vector.broadcast %16 : vector<1x1x8xf32> to vector<2x1x8xf32>
    %18 = arith.addf %13, %17 : vector<2x1x8xf32>
    %c0_11 = arith.constant 0 : index
    %c0_12 = arith.constant 0 : index
    %c0_13 = arith.constant 0 : index
    %19 = vector.load %arg6[%c0_11, %c0_12, %c0_13] : memref<2x1x8xf32, #tpu.memory_space<vmem>>, vector<2x1x8xf32>
    tpu.vector_store %arg6[%c0_11, %c0_12, %c0_13], %18 {strides = array<i32>} : memref<2x1x8xf32, #tpu.memory_space<vmem>>, vector<2x1x8xf32>,
    return
  }
  func.func @transform_0(%arg0: i32) -> (i32, i32, i32) {
    %c0_i32 = arith.constant 0 : i32
    %c0_i32_0 = arith.constant 0 : i32
    %c0_i32_1 = arith.constant 0 : i32
    return %arg0, %c0_i32, %c0_i32_0 : i32, i32, i32
  }
  func.func @transform_1(%arg0: i32) -> (i32, i32) {
    %c0_i32 = arith.constant 0 : i32
    %c0_i32_0 = arith.constant 0 : i32
    %c0_i32_1 = arith.constant 0 : i32
    return %c0_i32, %c0_i32_0 : i32, i32
  }
  func.func @transform_2(%arg0: i32) -> (i32, i32) {
    %c0_i32 = arith.constant 0 : i32
    %c0_i32_0 = arith.constant 0 : i32
    %c0_i32_1 = arith.constant 0 : i32
    return %c0_i32, %c0_i32_0 : i32, i32
  }
  func.func @transform_3(%arg0: i32) -> (i32, i32) {
    %c0_i32 = arith.constant 0 : i32
    %c0_i32_0 = arith.constant 0 : i32
    %c0_i32_1 = arith.constant 0 : i32
    return %c0_i32, %c0_i32_0 : i32, i32
  }
  func.func @transform_4(%arg0: i32) -> (i32, i32) {
    %c0_i32 = arith.constant 0 : i32
    %c0_i32_0 = arith.constant 0 : i32
    %c0_i32_1 = arith.constant 0 : i32
    return %c0_i32, %c0_i32_0 : i32, i32
  }
  func.func @transform_5(%arg0: i32) -> (i32, i32, i32) {
    %c0_i32 = arith.constant 0 : i32
    %c0_i32_0 = arith.constant 0 : i32
    %c0_i32_1 = arith.constant 0 : i32
    return %arg0, %c0_i32, %c0_i32_0 : i32, i32, i32
  }
}

</mosaic_0001>

<bundles_post_ra>
// kernel: tpu_custom_call.1
= control target key start
LH: loop header
LB: loop body
LE: loop exit
PB: predicated region body
PF: predicated region fallthrough
CT: control target
= control target key end

     0   :  { %s450_s0 = inlined_call_operand.vmem [shape: f32[2,4,16], index: 0, kind: input, shape index: {}]   ;;  %s451_s1 = inlined_call_operand.vmem [shape: f32[1,4], index: 1, kind: input, shape index: {}]   ;;  %s452_s2 = inlined_call_operand.vmem [shape: f32[16,8], index: 2, kind: input, shape index: {}]   ;;  %s453_s3 = inlined_call_operand.<no memory space> [shape: f32[1,1], index: 3, kind: input, shape index: {}]   ;;  %s454_s4 = inlined_call_operand.vmem [shape: f32[1,8], index: 4, kind: input, shape index: {}]   ;;  %s455_s5 = inlined_call_operand.hbm [shape: f32[2,1,8], index: 5, kind: output, shape index: {}]  }
   0x1   :  { %v10_v0 = vstv %s453_s3 }
   0x2   :  { %11 = vst [vmem:[#allocation2] sm:$0x1] %v10_v0 }
   0x3   :  { %v23_v1 = vld [vmem:[%s450_s0] sm:$0xf]  ;;  %vm40_vm0 = vcmask 1043456   ;;  %v379_v2 = vmov 0.0   ;;  %v24_v3 = vld [vmem:[%s450_s0 + $0x4] sm:$0xf] }
   0x4   :  { %326 = vmatprep.subr.mxu0 %v379_v2  ;;  %331 = vmatprep.subr.mxu1 %v379_v2  ;;  %v25_v4 = vld [vmem:[%s451_s1] sm:$0x1]  ;;  %vm36_vm1 = vcmask 31744   ;;  %vm380_vm2 = vmmov 0  }
   0x5   :  { %327 = vmatpush3.msk.msra.mxu0 %vm40_vm0, %v23_v1  ;;  %328 = vmatprep.mubr.msk.f32.mxu0 %vm380_vm2, %v379_v2 }
   0x6   :  { %12 = vsyncpa [#allocation4], 0  ;;  %332 = vmatpush3.msk.msra.mxu1 %vm40_vm0, %v24_v3  ;;  %333 = vmatprep.mubr.msk.f32.mxu1 %vm380_vm2, %v379_v2  ;;  %v381_v6 = vmov 0   ;;  %v187_v7 = vld [vmem:[%s452_s2] sm:$0xff]  ;;  %v188_v8 = vld [vmem:[%s452_s2 + $0x8] sm:$0xff]  ;;  %v382_v10 = vmov 0.0|0.0   ;;  %v32_v11 = vlaneseq }
   0x7   :  { %329 = vmatmul.mubr.msk.f32.vlgmr.msra.gmra.mrb[0].mxu0 %vm36_vm1, %v25_v4  ;;  %334 = vmatmul.mubr.msk.f32.vlgmr.msra.gmra.mrb[0].mxu1 %vm36_vm1, %v25_v4  ;;  %v344_v9 = vpack.c.bf16 %v188_v8, %v187_v7  ;;  %vm192_vm3 = vcmask 1041409   ;;  %vm194_vm4 = vcmask 130048   ;;  %v383_v24 = vmov 1966171168   ;;  %v292_v31 = vld [vmem:[%s454_s4] sm:$0x1] }
   0x8   :  { %354 = vset.pattern.permute.xlu0 %v381_v6  ;;  %340 = vmatprep.mubr.msk.f32.mxu0 %vm380_vm2, %v379_v2  ;;  %v33_v12 = vshrl.u32 %v32_v11, 7  ;;  %v269_v25 = vunpack.c.l.s4 %v383_v24  ;;  %s384_s28 = smov [#allocation3]   ;;  %vm295_vm5 = vcmask 57344  }
   0x9   :  { %v26_v5 = vld [vmem:[#allocation2] sm:$0x1]  ;;  %343 = vmatprep.subr.bf16.mxu0 %v382_v10  ;;  %s303_s29 = sshll.u32 %s384_s28, 4  ;;  %s304_s29 = int_to_ptr.vmem [resolvable:$true] %s303_s29 }
   0xa   :  { %29 = vperm.xlu0 %354, %v26_v5   ;;  %345 = vmatpush3.bf16.msra.mxu0 %v344_v9  ;;  %v34_v13 = vsub.s32 0, %v33_v12  ;;  %v270_v26 = vunpack.c.0.s8 %v269_v25  ;;  %s355_s30 = scalar_lea.vmem %s304_s29, 32  ;;  %p360_p1 = scmp.lt.s32.totalorder %s304_s29, %s304_s29 }
   0xb   :  { %p356_p0 = scmp.ne.s32.totalorder %s304_s29, %s355_s30  ;;  %p361_p2 = scmp.lt.s32.totalorder %s355_s30, %s355_s30 }
   0xc   :  { %v273_v27 = vsub.s32 %v270_v26, %v33_v12 }
   0xd   :  { %p362_p3 = por %p361_p2, %p360_p1 }
   0xf   :  { %p363_p4 = pnand %p362_p3, %p356_p0 }
  0x89   :  { %v30_v14 = vpop.permute.xlu0 %29 }
  0x8a   :  { %v35_v15 = vrot.slane %v30_v14, %v34_v13 }
  0xda   :  { %v110_v16 = vpop.f32.mrb[0].mxu0  ;;  %v183_v17 = vpop.f32.mrb[0].mxu1 }
  0xdb   :  { %v184_v18 = vadd.f32 %v183_v17, %v35_v15  ;;  %v335_v19 = vpop.f32.mrb[1].mxu1  ;;  %v330_v20 = vpop.f32.mrb[1].mxu0  ;;  %v111_v21 = vadd.f32 %v110_v16, %v35_v15 }
  0xdd   :  { %v191_v22 = vrot.slane %v184_v18, 7 }
  0xdf   :  { %v193_v23 = vsel %vm192_vm3, %v191_v22, %v111_v21 }
  0xe0   :  { %341 = vmatmul.mubr.msk.f32.vlgmr.msra.gmra.mrb[2].mxu0 %vm194_vm4, %v193_v23 }
 0x1b3   :  { %v263_v28 = vpop.f32.mrb[2].mxu0 }
 0x1b4   :  { %v274_v29 = vrot.slane %v263_v28, %v273_v27  ;;  %v342_v30 = vpop.f32.mrb[3].mxu0 }
 0x1b6   :  { %v275_v32 = vcombine.high %v274_v29, %v274_v29  ;;  %v282_v33 = vrot.slane %v274_v29, %v273_v27 }
 0x1b8   :  { %v289_v34 = vrot.slane %v275_v32, %v273_v27  ;;  %v293_v35 = vadd.f32 %v292_v31, %v282_v33 }
 0x1ba   :  { %v294_v36 = vadd.f32 %v292_v31, %v289_v34  ;;  %296 = vst.msk [vmem:[#allocation3] sm:$0x1] %vm295_vm5, %v293_v35 }
 0x1bc   :  { %297 = vst.msk [vmem:[#allocation3 + $0x1] sm:$0x1] %vm295_vm5, %v294_v36 }
 0x1bd   :  { %366 = shalt.err (!%p363_p4)
}
 0x1be   :  { %s367_s7 = scalar_lea.hbm %s455_s5, 32 }
 0x1bf   :  { %p368_p5 = scmp.ne.s32.totalorder %s455_s5, %s367_s7  ;;  %p371_p6 = scmp.lt.u32.totalorder %s367_s7, %s455_s5 }
 0x1c1   :  { %p373_p7 = pnand %p371_p6, %p368_p5 }
 0x1c3   :  { %376 = shalt.err (!%p373_p7)
}
 0x1c4   :  { %s385_s12 = smov 16   ;;  %s386_s13 = smov 1  }
 0x1c5   :  { %309 = dma.vmem_to_hbm [thread:$0]  %s304_s29, 32, %s455_s5, [#allocation4], %s385_s12, %s385_s12, %s386_s13  }
 0x1c6   :  { %377 = dma.done.wait [#allocation4], 32  }
 0x1c7   :  { %378 = vsyncadd [#allocation4], 4294967264 }
 0x1c8   :  { %313 = vsyncpa [#allocation4], 1 }

</bundles_post_ra>
